<compile_context>
chip_gen: v5e
topology: v5e:2x2
jax: 0.10.0
libtpu: 0.0.40
codegen_flags: <defaults>
</compile_context>

<pallas_src>
import functools
import math

import jax
import jax.numpy as jnp
from jax.experimental import pallas as pl
from jax.experimental.pallas import tpu as pltpu


def _focal(bce, alpha, gamma):
    base = 1.0 - jnp.exp(-bce)
    if float(gamma) == 2.0:          # static specialization: pow(x, 2.0) -> x*x
        pw = base * base
    else:
        pw = base ** gamma
    return alpha * pw * bce


def overall_loss_kernel(main_ref, centers_ref, regs_ref, out_ref, *,
                        batch, n_hm, n_reg, sigmax, sigmay, alpha, gamma):
    B = batch
    P = main_ref.shape[1]
    PR = regs_ref.shape[1]
    f32 = jnp.float32

    # ---- stacked main slab: rows [0,B) heatmap logits, row B = x grid, row B+1 = y grid
    hm = main_ref[0:B, :]                      # (B, P)  f32
    xg = main_ref[B:B + 1, :]                  # (1, P)
    yg = main_ref[B + 1:B + 2, :]              # (1, P)
    xc = centers_ref[:, 0:1]                   # (B, 1)
    yc = centers_ref[:, 1:2]                   # (B, 1)

    # ---- Gaussian reference heatmap, all batch rows at once (one exp over (B, P)) ----
    inv2sx2 = f32(1.0 / (2.0 * sigmax * sigmax))
    inv2sy2 = f32(1.0 / (2.0 * sigmay * sigmay))
    arg = (xg - xc) ** 2 * inv2sx2 + (yg - yc) ** 2 * inv2sy2       # (B, P)
    ref_hm = jnp.exp(-arg)                                          # (B, P)

    # ---- stable BCE-with-logits, reduction='sum', padding masked out -----------------
    lane = jax.lax.broadcasted_iota(jnp.int32, (1, P), 1)
    mask_hm = (lane < n_hm).astype(f32)                             # (1, P) -> bcast (B, P)
    bce_el = (jnp.maximum(hm, 0.0) - hm * ref_hm
              + jnp.log1p(jnp.exp(-jnp.abs(hm))))
    bce_main = jnp.sum(bce_el * mask_hm)                            # single reduction

    lmain = _focal(bce_main, alpha, gamma)

    # ---- regularizer BCE: row 0 = logits, row 1 = targets ---------------------------
    zr = regs_ref[0:1, :]                                           # (1, PR)
    tr = regs_ref[1:2, :]                                           # (1, PR)
    lane_r = jax.lax.broadcasted_iota(jnp.int32, (1, PR), 1)
    mask_r = (lane_r < n_reg).astype(f32)
    bce_r_el = (jnp.maximum(zr, 0.0) - zr * tr
                + jnp.log1p(jnp.exp(-jnp.abs(zr))))
    bce_reg = jnp.sum(bce_r_el * mask_r)

    lreg = _focal(bce_reg, 0.25, 2.0)

    out_ref[0, 0] = 3.0 * lmain + lreg


def _pad_last(a2d, width):
    pad = width - a2d.shape[-1]
    if pad > 0:
        a2d = jnp.pad(a2d, ((0, 0), (0, pad)))
    return a2d


def overall_loss(hm, tgt0, reg_in, reg_tgt, xg, yg, *, sigmax, sigmay,
                 alpha=0.25, gamma=2.0):
    """hm: (B,Lx,Ly) logits; tgt0: (B,2) centers; reg_in/reg_tgt: (B,N); xg/yg: (Lx,Ly)."""
    B, Lx, Ly = hm.shape
    n_hm = Lx * Ly
    P = ((n_hm + 127) // 128) * 128
    n_reg = int(reg_in.shape[0]) * int(reg_in.shape[1])
    PR = ((n_reg + 127) // 128) * 128

    # Lane-dense, DMA-merged operands (layout plumbing only; all compute stays in-kernel).
    main = jnp.concatenate(
        [_pad_last(hm.reshape(B, n_hm).astype(jnp.float32), P),
         _pad_last(xg.reshape(1, n_hm).astype(jnp.float32), P),
         _pad_last(yg.reshape(1, n_hm).astype(jnp.float32), P)], axis=0)      # (B+2, P)
    centers = _pad_last(tgt0.astype(jnp.float32), 128)                        # (B, 128)
    regs = jnp.concatenate(
        [_pad_last(reg_in.reshape(1, n_reg).astype(jnp.float32), PR),
         _pad_last(reg_tgt.reshape(1, n_reg).astype(jnp.float32), PR)], axis=0)  # (2, PR)

    kernel = functools.partial(
        overall_loss_kernel,
        batch=B, n_hm=n_hm, n_reg=n_reg,
        sigmax=float(sigmax), sigmay=float(sigmay),
        alpha=float(alpha), gamma=float(gamma))

    out = pl.pallas_call(
        kernel,
        out_shape=jax.ShapeDtypeStruct((1, 1), jnp.float32),
        in_specs=[
            pl.BlockSpec(memory_space=pltpu.VMEM),   # (B+2, P)  heatmap + grids
            pl.BlockSpec(memory_space=pltpu.VMEM),   # (B, 128)  centers
            pl.BlockSpec(memory_space=pltpu.VMEM),   # (2, PR)   reg logits + targets
        ],
        out_specs=pl.BlockSpec(memory_space=pltpu.SMEM),
    )(main, centers, regs)
    return out[0, 0]


def make_grids(para):
    """Reproduces FocalLoss_interaction.__init__ grid construction."""
    xmax, ymin, ymax = para['xmax'], para['ymin'], para['ymax']
    dx = dy = para['resolution']
    lateral = jnp.arange(int(-xmax / dx), int(xmax / dx) + 1, dtype=jnp.float32) * dx
    longitudinal = jnp.arange(int(ymin / dy), int(ymax / dy) + 1, dtype=jnp.float32) * dy
    len_x = lateral.shape[0]
    len_y = longitudinal.shape[0]
    # x[i, j] = lateral[i];  y[i, j] = longitudinal[j]   (shape (len_x, len_y))
    xg = jnp.tile(lateral[:, None], (1, len_y))
    yg = jnp.tile(longitudinal[None, :], (len_x, 1))
    return xg, yg


def ref_overall_loss(hm, tgt0, reg_in, reg_tgt, xg, yg, *, sigmax, sigmay,
                     alpha=0.25, gamma=2.0):
    # Pure-JAX reference for verification.
    xc = tgt0[:, 0][:, None, None]
    yc = tgt0[:, 1][:, None, None]
    ref_hm = jnp.exp(-((xg[None] - xc) ** 2) / sigmax ** 2 / 2.0
                     - ((yg[None] - yc) ** 2) / sigmay ** 2 / 2.0)

    def bce(z, t):
        return jnp.sum(jnp.maximum(z, 0.0) - z * t + jnp.log1p(jnp.exp(-jnp.abs(z))))

    b1 = bce(hm.astype(jnp.float32), ref_hm)
    lmain = alpha * (1.0 - jnp.exp(-b1)) ** gamma * b1
    b2 = bce(reg_in.astype(jnp.float32), reg_tgt.astype(jnp.float32))
    lreg = 0.25 * (1.0 - jnp.exp(-b2)) ** 2 * b2
    return 3.0 * lmain + lreg


if __name__ == "__main__":
    # Deterministic hyper-parameters (the module's "para" dict).
    para = dict(xmax=2.0, ymin=-2.0, ymax=2.0, resolution=0.5,
                sigmax=1.0, sigmay=1.5)
    xg, yg = make_grids(para)           # (9, 9) each
    Lx, Ly = xg.shape

    B, N = 2, 8
    key = jax.random.PRNGKey(0)
    k1, k2, k3, k4 = jax.random.split(key, 4)
    hm = jax.random.normal(k1, (B, Lx, Ly), dtype=jnp.float32)          # inputs[0]
    tgt0 = jax.random.uniform(k2, (B, 2), minval=-1.0, maxval=1.0,
                              dtype=jnp.float32)                        # targets[0]
    reg_in = jax.random.normal(k3, (B, N), dtype=jnp.float32)           # inputs[1]
    reg_tgt = jax.random.uniform(k4, (B, N), dtype=jnp.float32)         # targets[1]

    out = overall_loss(hm, tgt0, reg_in, reg_tgt, xg, yg,
                       sigmax=para['sigmax'], sigmay=para['sigmay'])
    out = jax.block_until_ready(out)

    expected = ref_overall_loss(hm, tgt0, reg_in, reg_tgt, xg, yg,
                                sigmax=para['sigmax'], sigmay=para['sigmay'])
    assert math.isfinite(float(out))
    assert abs(float(out) - float(expected)) <= 1e-3 * max(1.0, abs(float(expected))), \
        (float(out), float(expected))
    print("KERNEL_OK")
</pallas_src>

<mosaic_0001>
module attributes {stable_mosaic.version = 11 : i64} {
  func.func @overall_loss_kernel(%arg0: memref<4x128xf32, #tpu.memory_space<vmem>>, %arg1: memref<2x128xf32, #tpu.memory_space<vmem>>, %arg2: memref<2x128xf32, #tpu.memory_space<vmem>>, %arg3: memref<1x1xf32, #tpu.memory_space<smem>>) attributes {dimension_semantics = [], scalar_prefetch = 0 : i64, scratch_operands = 0 : i64, tpu.core_type = #tpu.core_type<tc>} {
    %c0 = arith.constant 0 : index
    %c0_0 = arith.constant 0 : index
    %0 = vector.load %arg0[%c0, %c0_0] : memref<4x128xf32, #tpu.memory_space<vmem>>, vector<2x128xf32>
    %c2 = arith.constant 2 : index
    %c0_1 = arith.constant 0 : index
    %1 = vector.load %arg0[%c2, %c0_1] : memref<4x128xf32, #tpu.memory_space<vmem>>, vector<1x128xf32>
    %c3 = arith.constant 3 : index
    %c0_2 = arith.constant 0 : index
    %2 = vector.load %arg0[%c3, %c0_2] : memref<4x128xf32, #tpu.memory_space<vmem>>, vector<1x128xf32>
    %c0_3 = arith.constant 0 : index
    %c0_4 = arith.constant 0 : index
    %3 = vector.load %arg1[%c0_3, %c0_4] : memref<2x128xf32, #tpu.memory_space<vmem>>, vector<2x1xf32>
    %c0_5 = arith.constant 0 : index
    %c1 = arith.constant 1 : index
    %4 = vector.load %arg1[%c0_5, %c1] : memref<2x128xf32, #tpu.memory_space<vmem>>, vector<2x1xf32>
    %5 = vector.broadcast %1 : vector<1x128xf32> to vector<2x128xf32>
    %6 = vector.broadcast %3 : vector<2x1xf32> to vector<2x128xf32>
    %7 = arith.subf %5, %6 : vector<2x128xf32>
    %8 = arith.mulf %7, %7 : vector<2x128xf32>
    %cst = arith.constant 5.000000e-01 : f32
    %9 = vector.broadcast %cst : f32 to vector<2x128xf32>
    %10 = arith.mulf %8, %9 : vector<2x128xf32>
    %11 = vector.broadcast %2 : vector<1x128xf32> to vector<2x128xf32>
    %12 = vector.broadcast %4 : vector<2x1xf32> to vector<2x128xf32>
    %13 = arith.subf %11, %12 : vector<2x128xf32>
    %14 = arith.mulf %13, %13 : vector<2x128xf32>
    %cst_6 = arith.constant 0.222222224 : f32
    %15 = vector.broadcast %cst_6 : f32 to vector<2x128xf32>
    %16 = arith.mulf %14, %15 : vector<2x128xf32>
    %17 = arith.addf %10, %16 : vector<2x128xf32>
    %cst_7 = arith.constant 0.000000e+00 : f32
    %18 = vector.broadcast %cst_7 : f32 to vector<2x128xf32>
    %19 = arith.subf %18, %17 : vector<2x128xf32>
    %20 = math.exp %19 : vector<2x128xf32>
    %21 = tpu.iota {dimensions = array<i32: 1>} : vector<1x128xi32>
    %c81_i32 = arith.constant 81 : i32
    %22 = vector.broadcast %c81_i32 : i32 to vector<1x128xi32>
    %23 = arith.cmpi slt, %21, %22 : vector<1x128xi32>
    %24 = arith.extui %23 : vector<1x128xi1> to vector<1x128xi32>
    %25 = arith.sitofp %24 : vector<1x128xi32> to vector<1x128xf32>
    %cst_8 = arith.constant 0.000000e+00 : f32
    %26 = vector.broadcast %cst_8 : f32 to vector<2x128xf32>
    %27 = arith.maximumf %0, %26 : vector<2x128xf32>
    %28 = arith.mulf %0, %20 : vector<2x128xf32>
    %29 = arith.subf %27, %28 : vector<2x128xf32>
    %30 = math.absf %0 : vector<2x128xf32>
    %cst_9 = arith.constant 0.000000e+00 : f32
    %31 = vector.broadcast %cst_9 : f32 to vector<2x128xf32>
    %32 = arith.subf %31, %30 : vector<2x128xf32>
    %33 = math.exp %32 : vector<2x128xf32>
    %34 = math.log1p %33 : vector<2x128xf32>
    %35 = arith.addf %29, %34 : vector<2x128xf32>
    %36 = vector.broadcast %25 : vector<1x128xf32> to vector<2x128xf32>
    %37 = arith.mulf %35, %36 : vector<2x128xf32>
    %38 = vector.shape_cast %37 : vector<2x128xf32> to vector<1x2x128xf32>
    %cst_10 = arith.constant dense<0.000000e+00> : vector<1xf32>
    %39 = vector.multi_reduction <add>, %38, %cst_10 [1, 2] : vector<1x2x128xf32> to vector<1xf32>
    %40 = vector.shape_cast %39 : vector<1xf32> to vector<1x1x1xf32>
    %41 = vector.extract %40[0, 0, 0] : f32 from vector<1x1x1xf32>
    %cst_11 = arith.constant 0.000000e+00 : f32
    %42 = arith.subf %cst_11, %41 : f32
    %43 = math.exp %42 : f32
    %cst_12 = arith.constant 1.000000e+00 : f32
    %44 = arith.subf %cst_12, %43 : f32
    %45 = arith.mulf %44, %44 : f32
    %cst_13 = arith.constant 2.500000e-01 : f32
    %46 = arith.mulf %cst_13, %45 : f32
    %47 = arith.mulf %46, %41 : f32
    %c0_14 = arith.constant 0 : index
    %c0_15 = arith.constant 0 : index
    %48 = vector.load %arg2[%c0_14, %c0_15] : memref<2x128xf32, #tpu.memory_space<vmem>>, vector<1x128xf32>
    %c1_16 = arith.constant 1 : index
    %c0_17 = arith.constant 0 : index
    %49 = vector.load %arg2[%c1_16, %c0_17] : memref<2x128xf32, #tpu.memory_space<vmem>>, vector<1x128xf32>
    %50 = tpu.iota {dimensions = array<i32: 1>} : vector<1x128xi32>
    %c16_i32 = arith.constant 16 : i32
    %51 = vector.broadcast %c16_i32 : i32 to vector<1x128xi32>
    %52 = arith.cmpi slt, %50, %51 : vector<1x128xi32>
    %53 = arith.extui %52 : vector<1x128xi1> to vector<1x128xi32>
    %54 = arith.sitofp %53 : vector<1x128xi32> to vector<1x128xf32>
    %cst_18 = arith.constant 0.000000e+00 : f32
    %55 = vector.broadcast %cst_18 : f32 to vector<1x128xf32>
    %56 = arith.maximumf %48, %55 : vector<1x128xf32>
    %57 = arith.mulf %48, %49 : vector<1x128xf32>
    %58 = arith.subf %56, %57 : vector<1x128xf32>
    %59 = math.absf %48 : vector<1x128xf32>
    %cst_19 = arith.constant 0.000000e+00 : f32
    %60 = vector.broadcast %cst_19 : f32 to vector<1x128xf32>
    %61 = arith.subf %60, %59 : vector<1x128xf32>
    %62 = math.exp %61 : vector<1x128xf32>
    %63 = math.log1p %62 : vector<1x128xf32>
    %64 = arith.addf %58, %63 : vector<1x128xf32>
    %65 = arith.mulf %64, %54 : vector<1x128xf32>
    %66 = vector.shape_cast %65 : vector<1x128xf32> to vector<1x1x128xf32>
    %cst_20 = arith.constant dense<0.000000e+00> : vector<1xf32>
    %67 = vector.multi_reduction <add>, %66, %cst_20 [1, 2] : vector<1x1x128xf32> to vector<1xf32>
    %68 = vector.shape_cast %67 : vector<1xf32> to vector<1x1x1xf32>
    %69 = vector.extract %68[0, 0, 0] : f32 from vector<1x1x1xf32>
    %cst_21 = arith.constant 0.000000e+00 : f32
    %70 = arith.subf %cst_21, %69 : f32
    %71 = math.exp %70 : f32
    %cst_22 = arith.constant 1.000000e+00 : f32
    %72 = arith.subf %cst_22, %71 : f32
    %73 = arith.mulf %72, %72 : f32
    %cst_23 = arith.constant 2.500000e-01 : f32
    %74 = arith.mulf %cst_23, %73 : f32
    %75 = arith.mulf %74, %69 : f32
    %cst_24 = arith.constant 3.000000e+00 : f32
    %76 = arith.mulf %cst_24, %47 : f32
    %77 = arith.addf %76, %75 : f32
    %c0_25 = arith.constant 0 : index
    %c0_26 = arith.constant 0 : index
    %78 = memref.load %arg3[%c0_25, %c0_26] : memref<1x1xf32, #tpu.memory_space<smem>>
    memref.store %77, %arg3[%c0_25, %c0_26] : memref<1x1xf32, #tpu.memory_space<smem>>
    return
  }
}

</mosaic_0001>

<bundles_post_ra>
// kernel: tpu_custom_call.1
= control target key start
LH: loop header
LB: loop body
LE: loop exit
PB: predicated region body
PF: predicated region fallthrough
CT: control target
= control target key end

     0   :  { %8 = vsyncpa [#allocation3], 0  ;;  %s358_s0 = inlined_call_operand.hbm [shape: f32[4,128], index: 0, kind: input, shape index: {}]   ;;  %s359_s1 = inlined_call_operand.hbm [shape: f32[2,128], index: 1, kind: input, shape index: {}]   ;;  %s360_s2 = inlined_call_operand.hbm [shape: f32[2,128], index: 2, kind: input, shape index: {}]   ;;  %s361_s3 = inlined_call_operand.hbm [shape: f32[1,1], index: 3, kind: output, shape index: {}]  }
   0x1   :  { %9 = vsyncpa [#allocation6], 0  ;;  %s27_s14 = sshll.u32 %s359_s1, 4  ;;  %s28_s14 = int_to_ptr.hbm [resolvable:$true] %s27_s14 }
   0x2   :  { %10 = vsyncpa [#allocation4], 0  ;;  %s313_s15 = smov [#allocation5]   ;;  %s16_s19 = sshll.u32 %s358_s0, 4  ;;  %s17_s19 = int_to_ptr.hbm [resolvable:$true] %s16_s19 }
   0x3   :  { %s29_s16 = sshll.u32 %s313_s15, 4  ;;  %s314_s20 = smov [#allocation2]   ;;  %s30_s16 = int_to_ptr.vmem [resolvable:$true] %s29_s16 }
   0x4   :  { %32 = dma.hbm_to_vmem [thread:$0]  %s28_s14, 32, %s30_s16, [#allocation6]  }
   0x5   :  { %s18_s21 = sshll.u32 %s314_s20, 4  ;;  %s38_s24 = sshll.u32 %s360_s2, 4  ;;  %s19_s21 = int_to_ptr.vmem [resolvable:$true] %s18_s21  ;;  %s39_s24 = int_to_ptr.hbm [resolvable:$true] %s38_s24 }
   0x6   :  { %21 = dma.hbm_to_vmem [thread:$0]  %s17_s19, 64, %s19_s21, [#allocation3]  }
   0x7   :  { %s315_s1 = smov [#allocation7]  }
   0x8   :  { %s40_s25 = sshll.u32 %s315_s1, 4  ;;  %s41_s25 = int_to_ptr.vmem [resolvable:$true] %s40_s25 }
   0x9   :  { %43 = dma.hbm_to_vmem [thread:$0]  %s39_s24, 32, %s41_s25, [#allocation6]  }
   0xa   :  { %307 = dma.done.wait [#allocation3], 64  }
   0xb   :  { %308 = vsyncadd [#allocation3], 4294967232 }
   0xc   :  { %309 = dma.done.wait [#allocation6], 64  }
   0xd   :  { %310 = vsyncadd [#allocation6], 4294967232  ;;  %v316_v0 = vmov 0   ;;  %v59_v1 = vld [vmem:[#allocation5] sm:$0x3]  ;;  %v317_v2 = vmov 1   ;;  %v81_v30 = vlaneseq }
   0xe   :  { %205 = vset.pattern.permute.xlu0 %v316_v0  ;;  %v56_v3 = vld [vmem:[#allocation2] sm:$0x3]  ;;  %v207_v8 = vld [vmem:[#allocation2 + $0x2] ss:$0 sm:$0xff]  ;;  %v208_v10 = vld [vmem:[#allocation2 + $0x3] ss:$0 sm:$0xff] }
   0xf   :  { %63 = vperm.xlu0 %205, %v59_v1   ;;  %v89_v4 = vand.u32 2147483647, %v56_v3  ;;  %v124_v11 = vld [vmem:[#allocation7] sm:$0x1]  ;;  %v125_v34 = vld [vmem:[#allocation7 + $0x1] sm:$0x1] }
  0x10   :  { %v132_v12 = vand.u32 2147483647, %v124_v11  ;;  %v82_v36 = vand.u32 127, %v81_v30  ;;  %v86_v40 = vmax.f32 %v56_v3, 0.0  ;;  %v129_v42 = vmax.f32 %v124_v11, 0.0  ;;  %s176_s12 = sshll.u32 %s361_s3, 4  ;;  %s177_s12 = int_to_ptr.hbm [resolvable:$true] %s176_s12 }
  0x11   :  { %v90_v5 = vsub.f32 0.0, %v89_v4  ;;  %v130_v43 = vmul.f32 %v125_v34, %v124_v11  ;;  %v318_v52 = vmov 0.0   ;;  %vm104_vm4 = vcmask 1041408   ;;  %s319_s16 = smov [#allocation8]  }
  0x12   :  { %v133_v14 = vsub.f32 0.0, %v132_v12  ;;  %vm83_vm1 = vcmp.lt.s32.totalorder %v82_v36, 81  ;;  %vm126_vm3 = vcmp.lt.s32.totalorder %v82_v36, 16  ;;  %vm147_vm5 = vcmask 1040384  }
  0x13   :  { %v91_v7 = vmul.f32 1.442695, %v90_v5  ;;  %v131_v51 = vsub.f32 %v129_v42, %v130_v43  ;;  %v188_v53 = vsel %vm83_vm1, 1.0, %v318_v52  ;;  %v189_v58 = vsel %vm126_vm3, 1.0, %v318_v52 }
  0x14   :  { %v134_v18 = vmul.f32 1.442695, %v133_v14 }
  0x15   :  { %209 = vpow2.f32 %v91_v7 }
  0x16   :  { %211 = vpow2.f32 %v134_v18 }
  0x17   :  { %206 = vset.pattern.permute.xlu0 %v317_v2 }
  0x18   :  { %71 = vperm.xlu0 %206, %v59_v1  }
  0x1b   :  { %v210_v15 = vpop.eup %209 }
  0x1c   :  { %v93_v20 = vadd.f32 1.0, %v210_v15  ;;  %v96_v25 = vmul.f32 -0.5, %v210_v15  ;;  %v212_v26 = vpop.eup %211  ;;  %v99_v33 = vand.u32 2147483647, %v210_v15 }
  0x1d   :  { %v136_v28 = vadd.f32 1.0, %v212_v26  ;;  %v139_v29 = vmul.f32 -0.5, %v212_v26  ;;  %v142_v37 = vand.u32 2147483647, %v212_v26 }
  0x1e   :  { %213 = vlog2.f32 %v93_v20  ;;  %v97_v31 = vadd.f32 1.0, %v96_v25  ;;  %vm349_vm0 = vcmp.lt.f32.partialorder %v99_v33, 0.0004427343 }
  0x1f   :  { %v140_v35 = vadd.f32 1.0, %v139_v29  ;;  %vm143_vm2 = vcmp.lt.f32.partialorder %v142_v37, 0.0004427343 }
  0x20   :  { %v98_v39 = vmul.f32 %v210_v15, %v97_v31 }
  0x21   :  { %v141_v45 = vmul.f32 %v212_v26, %v140_v35 }
  0x24   :  { %v214_v32 = vpop.eup %213 }
  0x25   :  { %v95_v38 = vmul.f32 0.6931472, %v214_v32 }
  0x27   :  { %v101_v48 = vsel %vm349_vm0, %v98_v39, %v95_v38 }
  0x81   :  { %v64_v6 = vpop.permute.xlu0 %63 }
  0x82   :  { %v66_v9 = vsub.f32 %v207_v8, %v64_v6 }
  0x84   :  { %v67_v16 = vmul.f32 %v66_v9, %v66_v9 }
  0x86   :  { %v68_v21 = vmul.f32 0.5, %v67_v16 }
  0x8a   :  { %v72_v13 = vpop.permute.xlu0 %71 }
  0x8b   :  { %v74_v17 = vsub.f32 %v208_v10, %v72_v13 }
  0x8d   :  { %v75_v19 = vmul.f32 %v74_v17, %v74_v17 }
  0x8f   :  { %v76_v22 = vmul.f32 0.22222222, %v75_v19 }
  0x91   :  { %v77_v23 = vadd.f32 %v76_v22, %v68_v21 }
  0x93   :  { %v78_v24 = vsub.f32 0.0, %v77_v23 }
  0x95   :  { %v79_v27 = vmul.f32 1.442695, %v78_v24 }
  0x97   :  { %215 = vpow2.f32 %v79_v27 }
  0x98   :  { %217 = vlog2.f32 %v136_v28 }
  0x9d   :  { %v216_v44 = vpop.eup %215 }
  0x9e   :  { %v218_v46 = vpop.eup %217  ;;  %v87_v47 = vmul.f32 %v216_v44, %v56_v3 }
  0x9f   :  { %v138_v49 = vmul.f32 0.6931472, %v218_v46 }
  0xa0   :  { %v88_v50 = vsub.f32 %v86_v40, %v87_v47 }
  0xa1   :  { %v144_v54 = vsel %vm143_vm2, %v141_v45, %v138_v49 }
  0xa2   :  { %v102_v55 = vadd.f32 %v101_v48, %v88_v50  ;;  %v145_v57 = vadd.f32 %v144_v54, %v131_v51 }
  0xa4   :  { %v103_v56 = vmul.f32 %v188_v53, %v102_v55  ;;  %v146_v60 = vmul.f32 %v189_v58, %v145_v57 }
  0xa6   :  { %v105_v59 = vsel %vm104_vm4, %v103_v56, 0.0  ;;  %v148_v61 = vsel %vm147_vm5, %v146_v60, 0.0 }
  0xa7   :  { %106 = vadd.xlane.f32.xlu1 %v105_v59 }
  0xaf   :  { %149 = vadd.xlane.f32.xlu1 %v148_v61 }
 0x11a   :  { %v107_v62 = vpop.xlane.xlu1 %106 }
 0x11b   :  { %v108_v63 = vrot.slane %v107_v62, 4 }
 0x11d   :  { %v109_v0 = vadd.f32 %v108_v63, %v107_v62 }
 0x11f   :  { %v110_v1 = vrot.slane %v109_v0, 2 }
 0x121   :  { %v111_v2 = vadd.f32 %v110_v1, %v109_v0 }
 0x122   :  { %v150_v5 = vpop.xlane.xlu1 %149 }
 0x123   :  { %v112_v3 = vrot.slane %v111_v2, 1  ;;  %v151_v6 = vrot.slane %v150_v5, 4 }
 0x125   :  { %v113_v4 = vadd.f32 %v112_v3, %v111_v2  ;;  %v152_v7 = vadd.f32 %v151_v6, %v150_v5 }
 0x127   :  { %190 = vpush %v113_v4  ;;  %v153_v8 = vrot.slane %v152_v7, 2 }
 0x129   :  { %v154_v10 = vadd.f32 %v153_v8, %v152_v7 }
 0x12b   :  { %v155_v12 = vrot.slane %v154_v10, 1 }
 0x12d   :  { %v156_v14 = vadd.f32 %v155_v12, %v154_v10 }
 0x158   :  { %s191_s0 = spop %190 }
 0x159   :  { %s115_s2 = ssub.f32 0.0, %s191_s0 }
 0x15b   :  { %v116_v9 = vstv %s115_s2 }
 0x15c   :  { %v117_v11 = vmul.f32 1.442695, %v116_v9 }
 0x15e   :  { %219 = vpow2.f32 %v117_v11 }
 0x164   :  { %v220_v13 = vpop.eup %219 }
 0x165   :  { %192 = vpush %v220_v13 }
 0x166   :  { %194 = vpush %v156_v14 }
 0x196   :  { %s193_s26 = spop %192 }
 0x197   :  { %s195_s27 = spop %194  ;;  %s120_s29 = ssub.f32 1.0, %s193_s26 }
 0x198   :  { %s158_s28 = ssub.f32 0.0, %s195_s27 }
 0x199   :  { %s121_s30 = smul.f32 %s120_s29, %s120_s29 }
 0x19a   :  { %v159_v15 = vstv %s158_s28 }
 0x19b   :  { %v160_v16 = vmul.f32 1.442695, %v159_v15  ;;  %s122_s4 = smul.f32 0.25, %s121_s30 }
 0x19d   :  { %221 = vpow2.f32 %v160_v16  ;;  %s123_s7 = smul.f32 %s191_s0, %s122_s4 }
 0x19f   :  { %s167_s13 = smul.f32 3.0, %s123_s7 }
 0x1a3   :  { %v222_v17 = vpop.eup %221 }
 0x1a4   :  { %196 = vpush %v222_v17 }
 0x1d5   :  { %s197_s5 = spop %196 }
 0x1d6   :  { %s163_s6 = ssub.f32 1.0, %s197_s5 }
 0x1d8   :  { %s164_s8 = smul.f32 %s163_s6, %s163_s6 }
 0x1da   :  { %s165_s9 = smul.f32 0.25, %s164_s8 }
 0x1dc   :  { %s166_s14 = smul.f32 %s195_s27, %s165_s9 }
 0x1de   :  { %s168_s15 = sadd.f32 %s167_s13, %s166_s14 }
 0x1e0   :  { %170 = sst [smem:[#allocation8]] %s168_s15 }
 0x1e1   :  { %179 = dma.smem_to_hbm %s319_s16, 16, %s177_s12, [#allocation4]  }
 0x1e2   :  { %311 = dma.done.wait [#allocation4], 16  }
 0x1e3   :  { %312 = vsyncadd [#allocation4], 4294967280 }
 0x1e4   :  { %184 = sfence }
 0x1e5   :  { %185 = vsyncpa [#allocation3], 1 }
 0x1e6   :  { %186 = vsyncpa [#allocation6], 1 }
 0x1e7   :  { %187 = vsyncpa [#allocation4], 1 }

</bundles_post_ra>
